<compile_context>
chip_gen: v6e
topology: v6e:2x2x1
jax: 0.10.0
libtpu: 0.0.40
codegen_flags: <defaults>
</compile_context>

<pallas_src>
import functools
import math

import jax
import jax.numpy as jnp
from jax.experimental import pallas as pl
from jax.experimental.pallas import tpu as pltpu


# ---------------------------------------------------------------------------
# Fused encoder kernel (grid = K-tiles of the first, n_input-sized matmul)
# ---------------------------------------------------------------------------
def _balsam_encoder_kernel(
    x_ref,                              # (B, tk)        f32   streamed over K
    w0_ref,                             # (tk, H)        bf16  streamed over K
    b0_ref, g0_ref, be0_ref,            # (1, H)         f32
    w1_ref,                             # (H, H)         bf16
    b1_ref, g1_ref, be1_ref,            # (1, H)         f32
    w2_ref,                             # (H, H)         bf16
    b2_ref, g2_ref, be2_ref,            # (1, H)         f32
    wh_ref,                             # (H, 2*n_out)   bf16  packed [wm | wv]
    bh_ref,                             # (1, 2*n_out)   f32   packed [bm | bv]
    head_ref,                           # (B, 2*n_out)   f32   packed [q_m | v_raw] output
    acc_ref,                            # (B, H)         f32   scratch accumulator
    *, bn_eps, log_variational,
):
    k = pl.program_id(0)

    @pl.when(k == 0)
    def _():
        acc_ref[...] = jnp.zeros_like(acc_ref)

    x = x_ref[...]
    # log(1+x) on the f32 tile, then bf16 operands for the MXU (f32 accumulation).
    a = jnp.log(1.0 + x) if log_variational else x
    acc_ref[...] += jnp.dot(a.astype(jnp.bfloat16), w0_ref[...],
                            preferred_element_type=jnp.float32)

    @pl.when(k == pl.num_programs(0) - 1)
    def _():
        def bn_relu(y, g_ref, be_ref):
            # Training-mode BatchNorm1d statistics (biased variance, eps=bn_eps).
            # One-pass variance; gamma * rsqrt folded into a single per-feature scale.
            mu = jnp.mean(y, axis=0, keepdims=True)
            var = jnp.mean(y * y, axis=0, keepdims=True) - mu * mu
            scale = g_ref[...] * jax.lax.rsqrt(var + bn_eps)
            shift = be_ref[...] - mu * scale
            return jnp.maximum(y * scale + shift, 0.0)

        def fc(h, w_ref, b_ref):
            return jnp.dot(h.astype(jnp.bfloat16), w_ref[...],
                           preferred_element_type=jnp.float32) + b_ref[...]

        h = bn_relu(acc_ref[...] + b0_ref[...], g0_ref, be0_ref)     # layer 0 (K-tiled dot)
        h = bn_relu(fc(h, w1_ref, b1_ref), g1_ref, be1_ref)          # layer 1
        h = bn_relu(fc(h, w2_ref, b2_ref), g2_ref, be2_ref)          # layer 2
        head_ref[...] = fc(h, wh_ref, bh_ref)                        # packed mean/var heads


# ---------------------------------------------------------------------------
# Wrapper
# ---------------------------------------------------------------------------
def balsam_encoder_forward(x, params, eps, *, bn_eps=1e-3, log_variational=True, tk=512):
    B, n_input = x.shape
    H = params["w1"].shape[0]
    n_out2 = params["wh"].shape[1]        # 2 * n_output (lane-dense when n_output == 64)
    n_output = n_out2 // 2

    # ---- layer-0 K tiling ----------------------------------------------------------
    if n_input <= tk:
        tk_eff = n_input                  # single K step; full-extent block is always legal
    else:
        assert tk % 128 == 0, "tk must be a multiple of 128 when tiling the input axis"
        tk_eff = tk
    n_k = pl.cdiv(n_input, tk_eff)
    n_in_pad = n_k * tk_eff
    w0 = params["w0"]
    if n_in_pad != n_input:
        # Zero padding is exact: log(1+0) = 0 contributes nothing to the matmul.
        x = jnp.pad(x, ((0, 0), (0, n_in_pad - n_input)))
        w0 = jnp.pad(w0, ((0, n_in_pad - n_input), (0, 0)))

    kernel = functools.partial(_balsam_encoder_kernel,
                               bn_eps=float(bn_eps),
                               log_variational=bool(log_variational))

    def vec_spec():
        return pl.BlockSpec((1, H), lambda k: (0, 0))

    in_specs = [
        pl.BlockSpec((B, tk_eff), lambda k: (0, k)),     # x   (streamed over K)
        pl.BlockSpec((tk_eff, H), lambda k: (k, 0)),     # w0  (streamed over K)
        vec_spec(), vec_spec(), vec_spec(),              # b0, g0, be0
        pl.BlockSpec((H, H), lambda k: (0, 0)),          # w1
        vec_spec(), vec_spec(), vec_spec(),              # b1, g1, be1
        pl.BlockSpec((H, H), lambda k: (0, 0)),          # w2
        vec_spec(), vec_spec(), vec_spec(),              # b2, g2, be2
        pl.BlockSpec((H, n_out2), lambda k: (0, 0)),     # wh (packed heads)
        pl.BlockSpec((1, n_out2), lambda k: (0, 0)),     # bh
    ]
    out_spec = pl.BlockSpec((B, n_out2), lambda k: (0, 0))

    # VMEM budget: double-buffered streamed K-tiles + resident weights + scratch + headroom.
    vmem_bytes = (
        2 * (B * tk_eff * 4 + tk_eff * H * 2)      # pipelined x (f32) / w0 (bf16) tiles
        + 2 * (2 * H * H + H * n_out2) * 2         # w1, w2, wh (bf16)
        + 2 * (B * n_out2 * 4)                     # packed lane-dense output
        + B * H * 4                                # f32 accumulator scratch
        + (2 << 20)                                # biases / BN params / slack
    )
    vmem_limit = int(min(max(2 * vmem_bytes, 16 * 2**20), 48 * 2**20))

    head = pl.pallas_call(
        kernel,
        out_shape=jax.ShapeDtypeStruct((B, n_out2), jnp.float32),
        grid_spec=pltpu.PrefetchScalarGridSpec(
            num_scalar_prefetch=0,
            grid=(n_k,),
            in_specs=in_specs,
            out_specs=out_spec,
            scratch_shapes=[pltpu.VMEM((B, H), jnp.float32)],
        ),
        compiler_params=pltpu.CompilerParams(
            dimension_semantics=("arbitrary",),    # K is a reduction axis
            vmem_limit_bytes=vmem_limit,
        ),
    )(
        x, w0,
        params["b0"], params["g0"], params["be0"],
        params["w1"], params["b1"], params["g1"], params["be1"],
        params["w2"], params["b2"], params["g2"], params["be2"],
        params["wh"], params["bh"],
    )

    # Trivial elementwise epilogue on the lane-dense packed slab (split / clamp / exp /
    # reparameterize) — keeping it in XLA avoids sub-128-wide masked stores in the kernel.
    q_m = head[:, :n_output]
    q_v = jnp.exp(jnp.clip(head[:, n_output:], -4.0, 4.0) * 0.5)
    latent = q_m + jnp.sqrt(q_v) * eps
    return q_m, q_v, latent


# ---------------------------------------------------------------------------
# Parameter init (mirrors PyTorch defaults: nn.Linear uniform init, BN gamma=1, beta=0).
# Weights are stored in bf16 (MXU operands); biases / BN params stay f32.
# ---------------------------------------------------------------------------
def init_params(key, n_input, n_output, n_hidden=128):
    ks = jax.random.split(key, 5)

    def linear(k, fan_in, fan_out):
        kw, kb = jax.random.split(k)
        bound = 1.0 / math.sqrt(fan_in)
        w = jax.random.uniform(kw, (fan_in, fan_out), jnp.float32, -bound, bound)
        b = jax.random.uniform(kb, (1, fan_out), jnp.float32, -bound, bound)
        return w, b

    w0, b0 = linear(ks[0], n_input, n_hidden)
    w1, b1 = linear(ks[1], n_hidden, n_hidden)
    w2, b2 = linear(ks[2], n_hidden, n_hidden)
    wm, bm = linear(ks[3], n_hidden, n_output)
    wv, bv = linear(ks[4], n_hidden, n_output)

    ones = jnp.ones((1, n_hidden), jnp.float32)
    zeros = jnp.zeros((1, n_hidden), jnp.float32)
    bf16 = jnp.bfloat16
    return dict(
        w0=w0.astype(bf16), b0=b0, g0=ones, be0=zeros,
        w1=w1.astype(bf16), b1=b1, g1=ones, be1=zeros,
        w2=w2.astype(bf16), b2=b2, g2=ones, be2=zeros,
        wh=jnp.concatenate([wm, wv], axis=1).astype(bf16),   # packed [wm | wv]
        bh=jnp.concatenate([bm, bv], axis=1),                 # packed [bm | bv]
    )


# ---------------------------------------------------------------------------
# Pure-JAX reference (faithful two-pass BN; same bf16 matmul operands as the kernel)
# ---------------------------------------------------------------------------
def ref_forward(x, params, eps, bn_eps=1e-3, log_variational=True):
    bf16 = jnp.bfloat16
    h = jnp.log(1.0 + x) if log_variational else x
    for i in range(3):
        w, b = params[f"w{i}"], params[f"b{i}"]
        g, be = params[f"g{i}"], params[f"be{i}"]
        y = jnp.dot(h.astype(bf16), w, preferred_element_type=jnp.float32) + b
        mu = y.mean(axis=0, keepdims=True)
        var = ((y - mu) ** 2).mean(axis=0, keepdims=True)
        h = jnp.maximum((y - mu) / jnp.sqrt(var + bn_eps) * g + be, 0.0)
    head = jnp.dot(h.astype(bf16), params["wh"],
                   preferred_element_type=jnp.float32) + params["bh"]
    n_output = head.shape[1] // 2
    q_m = head[:, :n_output]
    q_v = jnp.exp(jnp.clip(head[:, n_output:], -4.0, 4.0) / 2.0)
    latent = q_m + jnp.sqrt(q_v) * eps
    return q_m, q_v, latent


if __name__ == "__main__":
    batch = 16       # rows (multiple of 8 sublanes; BN wants the whole batch in one call)
    n_input = 256    # input features (genes)
    n_hidden = 128   # FCLayers hidden width (lane-dense)
    n_output = 64    # latent topic dimension -> packed head width 128 (lane-dense)

    key = jax.random.PRNGKey(0)
    k_params, k_x, k_eps = jax.random.split(key, 3)

    params = init_params(k_params, n_input, n_output, n_hidden)
    # non-negative count-like input (the module applies log(1+x))
    x = jax.random.uniform(k_x, (batch, n_input), jnp.float32, 0.0, 5.0)
    # reparameterization noise (torch Normal.rsample), precomputed deterministically
    eps = jax.random.normal(k_eps, (batch, n_output), jnp.float32)

    # tk=128 -> 2 K-steps, exercising the pipelined / accumulated layer-0 path.
    q_m, q_v, latent = jax.block_until_ready(
        balsam_encoder_forward(x, params, eps, tk=128))

    q_m_ref, q_v_ref, latent_ref = ref_forward(x, params, eps)

    # bf16 matmul operands are identical in kernel and reference; the tolerance covers f32
    # accumulation-order and one-pass-vs-two-pass BN-variance rounding differences.
    assert jnp.allclose(q_m, q_m_ref, atol=5e-3, rtol=5e-3), "q_m mismatch"
    assert jnp.allclose(q_v, q_v_ref, atol=5e-3, rtol=5e-3), "q_v mismatch"
    assert jnp.allclose(latent, latent_ref, atol=5e-3, rtol=5e-3), "latent mismatch"

    print("KERNEL_OK")
</pallas_src>

<mosaic_0001>
module attributes {stable_mosaic.version = 11 : i64} {
  func.func @_balsam_encoder_kernel(%arg0: i32, %arg1: memref<16x128xf32, #tpu.memory_space<vmem>>, %arg2: memref<128x128xbf16, #tpu.memory_space<vmem>>, %arg3: memref<1x128xf32, #tpu.memory_space<vmem>>, %arg4: memref<1x128xf32, #tpu.memory_space<vmem>>, %arg5: memref<1x128xf32, #tpu.memory_space<vmem>>, %arg6: memref<128x128xbf16, #tpu.memory_space<vmem>>, %arg7: memref<1x128xf32, #tpu.memory_space<vmem>>, %arg8: memref<1x128xf32, #tpu.memory_space<vmem>>, %arg9: memref<1x128xf32, #tpu.memory_space<vmem>>, %arg10: memref<128x128xbf16, #tpu.memory_space<vmem>>, %arg11: memref<1x128xf32, #tpu.memory_space<vmem>>, %arg12: memref<1x128xf32, #tpu.memory_space<vmem>>, %arg13: memref<1x128xf32, #tpu.memory_space<vmem>>, %arg14: memref<128x128xbf16, #tpu.memory_space<vmem>>, %arg15: memref<1x128xf32, #tpu.memory_space<vmem>>, %arg16: memref<16x128xf32, #tpu.memory_space<vmem>>, %arg17: memref<16x128xf32, #tpu.memory_space<vmem>>) attributes {dimension_semantics = [#tpu.dimension_semantics<arbitrary>], iteration_bounds = array<i64: 2>, scalar_prefetch = 0 : i64, scratch_operands = 1 : i64, tpu.core_type = #tpu.core_type<tc>, window_params = [{transform_indices = @transform_0, window_bounds = array<i64: 16, 128>}, {transform_indices = @transform_1, window_bounds = array<i64: 128, 128>}, {pipeline_mode = #tpu.pipeline_mode<synchronous>, transform_indices = @transform_2, window_bounds = array<i64: 1, 128>}, {pipeline_mode = #tpu.pipeline_mode<synchronous>, transform_indices = @transform_3, window_bounds = array<i64: 1, 128>}, {pipeline_mode = #tpu.pipeline_mode<synchronous>, transform_indices = @transform_4, window_bounds = array<i64: 1, 128>}, {pipeline_mode = #tpu.pipeline_mode<synchronous>, transform_indices = @transform_5, window_bounds = array<i64: 128, 128>}, {pipeline_mode = #tpu.pipeline_mode<synchronous>, transform_indices = @transform_6, window_bounds = array<i64: 1, 128>}, {pipeline_mode = #tpu.pipeline_mode<synchronous>, transform_indices = @transform_7, window_bounds = array<i64: 1, 128>}, {pipeline_mode = #tpu.pipeline_mode<synchronous>, transform_indices = @transform_8, window_bounds = array<i64: 1, 128>}, {pipeline_mode = #tpu.pipeline_mode<synchronous>, transform_indices = @transform_9, window_bounds = array<i64: 128, 128>}, {pipeline_mode = #tpu.pipeline_mode<synchronous>, transform_indices = @transform_10, window_bounds = array<i64: 1, 128>}, {pipeline_mode = #tpu.pipeline_mode<synchronous>, transform_indices = @transform_11, window_bounds = array<i64: 1, 128>}, {pipeline_mode = #tpu.pipeline_mode<synchronous>, transform_indices = @transform_12, window_bounds = array<i64: 1, 128>}, {pipeline_mode = #tpu.pipeline_mode<synchronous>, transform_indices = @transform_13, window_bounds = array<i64: 128, 128>}, {pipeline_mode = #tpu.pipeline_mode<synchronous>, transform_indices = @transform_14, window_bounds = array<i64: 1, 128>}, {pipeline_mode = #tpu.pipeline_mode<synchronous>, transform_indices = @transform_15, window_bounds = array<i64: 16, 128>}]} {
    %c0_i32 = arith.constant 0 : i32
    %0 = arith.cmpi eq, %arg0, %c0_i32 : i32
    %1 = arith.extui %0 : i1 to i32
    %c0_i32_0 = arith.constant 0 : i32
    %2 = arith.cmpi ne, %1, %c0_i32_0 : i32
    scf.if %2 {
      %cst_10 = arith.constant 0.000000e+00 : f32
      %16 = vector.broadcast %cst_10 : f32 to vector<16x128xf32>
      %c0_11 = arith.constant 0 : index
      %c0_12 = arith.constant 0 : index
      %17 = vector.load %arg17[%c0_11, %c0_12] : memref<16x128xf32, #tpu.memory_space<vmem>>, vector<16x128xf32>
      tpu.vector_store %arg17[%c0_11, %c0_12], %16 {strides = array<i32>} : memref<16x128xf32, #tpu.memory_space<vmem>>, vector<16x128xf32>,
    } else {
    }
    %c0 = arith.constant 0 : index
    %c0_1 = arith.constant 0 : index
    %3 = vector.load %arg1[%c0, %c0_1] : memref<16x128xf32, #tpu.memory_space<vmem>>, vector<16x128xf32>
    %cst = arith.constant 1.000000e+00 : f32
    %4 = vector.broadcast %cst : f32 to vector<16x128xf32>
    %5 = arith.addf %4, %3 : vector<16x128xf32>
    %6 = math.log %5 : vector<16x128xf32>
    %c0_2 = arith.constant 0 : index
    %c0_3 = arith.constant 0 : index
    %7 = vector.load %arg17[%c0_2, %c0_3] : memref<16x128xf32, #tpu.memory_space<vmem>>, vector<16x128xf32>
    %8 = arith.truncf %6 : vector<16x128xf32> to vector<16x128xbf16>
    %c0_4 = arith.constant 0 : index
    %c0_5 = arith.constant 0 : index
    %9 = vector.load %arg2[%c0_4, %c0_5] : memref<128x128xbf16, #tpu.memory_space<vmem>>, vector<128x128xbf16>
    %cst_6 = arith.constant dense<0.000000e+00> : vector<16x128xf32>
    %10 = tpu.matmul %8, %9, %cst_6 {dimension_numbers = #tpu.dot_dimension_numbers<[1], [0], [0], [1], [0, 0, 1, 1], [], []>} : vector<16x128xbf16>, vector<128x128xbf16>, vector<16x128xf32> -> vector<16x128xf32>
    %11 = arith.addf %7, %10 : vector<16x128xf32>
    %c0_7 = arith.constant 0 : index
    %c0_8 = arith.constant 0 : index
    %12 = vector.load %arg17[%c0_7, %c0_8] : memref<16x128xf32, #tpu.memory_space<vmem>>, vector<16x128xf32>
    tpu.vector_store %arg17[%c0_7, %c0_8], %11 {strides = array<i32>} : memref<16x128xf32, #tpu.memory_space<vmem>>, vector<16x128xf32>,
    %c1_i32 = arith.constant 1 : i32
    %13 = arith.cmpi eq, %arg0, %c1_i32 : i32
    %14 = arith.extui %13 : i1 to i32
    %c0_i32_9 = arith.constant 0 : i32
    %15 = arith.cmpi ne, %14, %c0_i32_9 : i32
    scf.if %15 {
      %c0_10 = arith.constant 0 : index
      %c0_11 = arith.constant 0 : index
      %16 = vector.load %arg17[%c0_10, %c0_11] : memref<16x128xf32, #tpu.memory_space<vmem>>, vector<16x128xf32>
      %c0_12 = arith.constant 0 : index
      %c0_13 = arith.constant 0 : index
      %17 = vector.load %arg3[%c0_12, %c0_13] : memref<1x128xf32, #tpu.memory_space<vmem>>, vector<1x128xf32>
      %18 = vector.broadcast %17 : vector<1x128xf32> to vector<16x128xf32>
      %19 = arith.addf %16, %18 : vector<16x128xf32>
      %cst_14 = arith.constant dense<0.000000e+00> : vector<128xf32>
      %20 = vector.multi_reduction <add>, %19, %cst_14 [0] : vector<16x128xf32> to vector<128xf32>
      %21 = vector.shape_cast %20 : vector<128xf32> to vector<1x128xf32>
      %cst_15 = arith.constant 1.600000e+01 : f32
      %22 = vector.broadcast %cst_15 : f32 to vector<1x128xf32>
      %23 = arith.divf %21, %22 : vector<1x128xf32>
      %24 = arith.mulf %19, %19 : vector<16x128xf32>
      %cst_16 = arith.constant dense<0.000000e+00> : vector<128xf32>
      %25 = vector.multi_reduction <add>, %24, %cst_16 [0] : vector<16x128xf32> to vector<128xf32>
      %26 = vector.shape_cast %25 : vector<128xf32> to vector<1x128xf32>
      %cst_17 = arith.constant 1.600000e+01 : f32
      %27 = vector.broadcast %cst_17 : f32 to vector<1x128xf32>
      %28 = arith.divf %26, %27 : vector<1x128xf32>
      %29 = arith.mulf %23, %23 : vector<1x128xf32>
      %30 = arith.subf %28, %29 : vector<1x128xf32>
      %c0_18 = arith.constant 0 : index
      %c0_19 = arith.constant 0 : index
      %31 = vector.load %arg4[%c0_18, %c0_19] : memref<1x128xf32, #tpu.memory_space<vmem>>, vector<1x128xf32>
      %cst_20 = arith.constant 1.000000e-03 : f32
      %32 = vector.broadcast %cst_20 : f32 to vector<1x128xf32>
      %33 = arith.addf %30, %32 : vector<1x128xf32>
      %34 = math.rsqrt %33 : vector<1x128xf32>
      %35 = arith.mulf %31, %34 : vector<1x128xf32>
      %c0_21 = arith.constant 0 : index
      %c0_22 = arith.constant 0 : index
      %36 = vector.load %arg5[%c0_21, %c0_22] : memref<1x128xf32, #tpu.memory_space<vmem>>, vector<1x128xf32>
      %37 = arith.mulf %23, %35 : vector<1x128xf32>
      %38 = arith.subf %36, %37 : vector<1x128xf32>
      %39 = vector.broadcast %35 : vector<1x128xf32> to vector<16x128xf32>
      %40 = arith.mulf %19, %39 : vector<16x128xf32>
      %41 = vector.broadcast %38 : vector<1x128xf32> to vector<16x128xf32>
      %42 = arith.addf %40, %41 : vector<16x128xf32>
      %cst_23 = arith.constant 0.000000e+00 : f32
      %43 = vector.broadcast %cst_23 : f32 to vector<16x128xf32>
      %44 = arith.maximumf %42, %43 : vector<16x128xf32>
      %45 = arith.truncf %44 : vector<16x128xf32> to vector<16x128xbf16>
      %c0_24 = arith.constant 0 : index
      %c0_25 = arith.constant 0 : index
      %46 = vector.load %arg6[%c0_24, %c0_25] : memref<128x128xbf16, #tpu.memory_space<vmem>>, vector<128x128xbf16>
      %cst_26 = arith.constant dense<0.000000e+00> : vector<16x128xf32>
      %47 = tpu.matmul %45, %46, %cst_26 {dimension_numbers = #tpu.dot_dimension_numbers<[1], [0], [0], [1], [0, 0, 1, 1], [], []>} : vector<16x128xbf16>, vector<128x128xbf16>, vector<16x128xf32> -> vector<16x128xf32>
      %c0_27 = arith.constant 0 : index
      %c0_28 = arith.constant 0 : index
      %48 = vector.load %arg7[%c0_27, %c0_28] : memref<1x128xf32, #tpu.memory_space<vmem>>, vector<1x128xf32>
      %49 = vector.broadcast %48 : vector<1x128xf32> to vector<16x128xf32>
      %50 = arith.addf %47, %49 : vector<16x128xf32>
      %cst_29 = arith.constant dense<0.000000e+00> : vector<128xf32>
      %51 = vector.multi_reduction <add>, %50, %cst_29 [0] : vector<16x128xf32> to vector<128xf32>
      %52 = vector.shape_cast %51 : vector<128xf32> to vector<1x128xf32>
      %cst_30 = arith.constant 1.600000e+01 : f32
      %53 = vector.broadcast %cst_30 : f32 to vector<1x128xf32>
      %54 = arith.divf %52, %53 : vector<1x128xf32>
      %55 = arith.mulf %50, %50 : vector<16x128xf32>
      %cst_31 = arith.constant dense<0.000000e+00> : vector<128xf32>
      %56 = vector.multi_reduction <add>, %55, %cst_31 [0] : vector<16x128xf32> to vector<128xf32>
      %57 = vector.shape_cast %56 : vector<128xf32> to vector<1x128xf32>
      %cst_32 = arith.constant 1.600000e+01 : f32
      %58 = vector.broadcast %cst_32 : f32 to vector<1x128xf32>
      %59 = arith.divf %57, %58 : vector<1x128xf32>
      %60 = arith.mulf %54, %54 : vector<1x128xf32>
      %61 = arith.subf %59, %60 : vector<1x128xf32>
      %c0_33 = arith.constant 0 : index
      %c0_34 = arith.constant 0 : index
      %62 = vector.load %arg8[%c0_33, %c0_34] : memref<1x128xf32, #tpu.memory_space<vmem>>, vector<1x128xf32>
      %cst_35 = arith.constant 1.000000e-03 : f32
      %63 = vector.broadcast %cst_35 : f32 to vector<1x128xf32>
      %64 = arith.addf %61, %63 : vector<1x128xf32>
      %65 = math.rsqrt %64 : vector<1x128xf32>
      %66 = arith.mulf %62, %65 : vector<1x128xf32>
      %c0_36 = arith.constant 0 : index
      %c0_37 = arith.constant 0 : index
      %67 = vector.load %arg9[%c0_36, %c0_37] : memref<1x128xf32, #tpu.memory_space<vmem>>, vector<1x128xf32>
      %68 = arith.mulf %54, %66 : vector<1x128xf32>
      %69 = arith.subf %67, %68 : vector<1x128xf32>
      %70 = vector.broadcast %66 : vector<1x128xf32> to vector<16x128xf32>
      %71 = arith.mulf %50, %70 : vector<16x128xf32>
      %72 = vector.broadcast %69 : vector<1x128xf32> to vector<16x128xf32>
      %73 = arith.addf %71, %72 : vector<16x128xf32>
      %cst_38 = arith.constant 0.000000e+00 : f32
      %74 = vector.broadcast %cst_38 : f32 to vector<16x128xf32>
      %75 = arith.maximumf %73, %74 : vector<16x128xf32>
      %76 = arith.truncf %75 : vector<16x128xf32> to vector<16x128xbf16>
      %c0_39 = arith.constant 0 : index
      %c0_40 = arith.constant 0 : index
      %77 = vector.load %arg10[%c0_39, %c0_40] : memref<128x128xbf16, #tpu.memory_space<vmem>>, vector<128x128xbf16>
      %cst_41 = arith.constant dense<0.000000e+00> : vector<16x128xf32>
      %78 = tpu.matmul %76, %77, %cst_41 {dimension_numbers = #tpu.dot_dimension_numbers<[1], [0], [0], [1], [0, 0, 1, 1], [], []>} : vector<16x128xbf16>, vector<128x128xbf16>, vector<16x128xf32> -> vector<16x128xf32>
      %c0_42 = arith.constant 0 : index
      %c0_43 = arith.constant 0 : index
      %79 = vector.load %arg11[%c0_42, %c0_43] : memref<1x128xf32, #tpu.memory_space<vmem>>, vector<1x128xf32>
      %80 = vector.broadcast %79 : vector<1x128xf32> to vector<16x128xf32>
      %81 = arith.addf %78, %80 : vector<16x128xf32>
      %cst_44 = arith.constant dense<0.000000e+00> : vector<128xf32>
      %82 = vector.multi_reduction <add>, %81, %cst_44 [0] : vector<16x128xf32> to vector<128xf32>
      %83 = vector.shape_cast %82 : vector<128xf32> to vector<1x128xf32>
      %cst_45 = arith.constant 1.600000e+01 : f32
      %84 = vector.broadcast %cst_45 : f32 to vector<1x128xf32>
      %85 = arith.divf %83, %84 : vector<1x128xf32>
      %86 = arith.mulf %81, %81 : vector<16x128xf32>
      %cst_46 = arith.constant dense<0.000000e+00> : vector<128xf32>
      %87 = vector.multi_reduction <add>, %86, %cst_46 [0] : vector<16x128xf32> to vector<128xf32>
      %88 = vector.shape_cast %87 : vector<128xf32> to vector<1x128xf32>
      %cst_47 = arith.constant 1.600000e+01 : f32
      %89 = vector.broadcast %cst_47 : f32 to vector<1x128xf32>
      %90 = arith.divf %88, %89 : vector<1x128xf32>
      %91 = arith.mulf %85, %85 : vector<1x128xf32>
      %92 = arith.subf %90, %91 : vector<1x128xf32>
      %c0_48 = arith.constant 0 : index
      %c0_49 = arith.constant 0 : index
      %93 = vector.load %arg12[%c0_48, %c0_49] : memref<1x128xf32, #tpu.memory_space<vmem>>, vector<1x128xf32>
      %cst_50 = arith.constant 1.000000e-03 : f32
      %94 = vector.broadcast %cst_50 : f32 to vector<1x128xf32>
      %95 = arith.addf %92, %94 : vector<1x128xf32>
      %96 = math.rsqrt %95 : vector<1x128xf32>
      %97 = arith.mulf %93, %96 : vector<1x128xf32>
      %c0_51 = arith.constant 0 : index
      %c0_52 = arith.constant 0 : index
      %98 = vector.load %arg13[%c0_51, %c0_52] : memref<1x128xf32, #tpu.memory_space<vmem>>, vector<1x128xf32>
      %99 = arith.mulf %85, %97 : vector<1x128xf32>
      %100 = arith.subf %98, %99 : vector<1x128xf32>
      %101 = vector.broadcast %97 : vector<1x128xf32> to vector<16x128xf32>
      %102 = arith.mulf %81, %101 : vector<16x128xf32>
      %103 = vector.broadcast %100 : vector<1x128xf32> to vector<16x128xf32>
      %104 = arith.addf %102, %103 : vector<16x128xf32>
      %cst_53 = arith.constant 0.000000e+00 : f32
      %105 = vector.broadcast %cst_53 : f32 to vector<16x128xf32>
      %106 = arith.maximumf %104, %105 : vector<16x128xf32>
      %107 = arith.truncf %106 : vector<16x128xf32> to vector<16x128xbf16>
      %c0_54 = arith.constant 0 : index
      %c0_55 = arith.constant 0 : index
      %108 = vector.load %arg14[%c0_54, %c0_55] : memref<128x128xbf16, #tpu.memory_space<vmem>>, vector<128x128xbf16>
      %cst_56 = arith.constant dense<0.000000e+00> : vector<16x128xf32>
      %109 = tpu.matmul %107, %108, %cst_56 {dimension_numbers = #tpu.dot_dimension_numbers<[1], [0], [0], [1], [0, 0, 1, 1], [], []>} : vector<16x128xbf16>, vector<128x128xbf16>, vector<16x128xf32> -> vector<16x128xf32>
      %c0_57 = arith.constant 0 : index
      %c0_58 = arith.constant 0 : index
      %110 = vector.load %arg15[%c0_57, %c0_58] : memref<1x128xf32, #tpu.memory_space<vmem>>, vector<1x128xf32>
      %111 = vector.broadcast %110 : vector<1x128xf32> to vector<16x128xf32>
      %112 = arith.addf %109, %111 : vector<16x128xf32>
      %c0_59 = arith.constant 0 : index
      %c0_60 = arith.constant 0 : index
      %113 = vector.load %arg16[%c0_59, %c0_60] : memref<16x128xf32, #tpu.memory_space<vmem>>, vector<16x128xf32>
      tpu.vector_store %arg16[%c0_59, %c0_60], %112 {strides = array<i32>} : memref<16x128xf32, #tpu.memory_space<vmem>>, vector<16x128xf32>,
    } else {
    }
    return
  }
  func.func @transform_0(%arg0: i32) -> (i32, i32) {
    %c0_i32 = arith.constant 0 : i32
    %c0_i32_0 = arith.constant 0 : i32
    return %c0_i32, %arg0 : i32, i32
  }
  func.func @transform_1(%arg0: i32) -> (i32, i32) {
    %c0_i32 = arith.constant 0 : i32
    %c0_i32_0 = arith.constant 0 : i32
    return %arg0, %c0_i32 : i32, i32
  }
  func.func @transform_2(%arg0: i32) -> (i32, i32) {
    %c0_i32 = arith.constant 0 : i32
    %c0_i32_0 = arith.constant 0 : i32
    %c0_i32_1 = arith.constant 0 : i32
    return %c0_i32, %c0_i32_0 : i32, i32
  }
  func.func @transform_3(%arg0: i32) -> (i32, i32) {
    %c0_i32 = arith.constant 0 : i32
    %c0_i32_0 = arith.constant 0 : i32
    %c0_i32_1 = arith.constant 0 : i32
    return %c0_i32, %c0_i32_0 : i32, i32
  }
  func.func @transform_4(%arg0: i32) -> (i32, i32) {
    %c0_i32 = arith.constant 0 : i32
    %c0_i32_0 = arith.constant 0 : i32
    %c0_i32_1 = arith.constant 0 : i32
    return %c0_i32, %c0_i32_0 : i32, i32
  }
  func.func @transform_5(%arg0: i32) -> (i32, i32) {
    %c0_i32 = arith.constant 0 : i32
    %c0_i32_0 = arith.constant 0 : i32
    %c0_i32_1 = arith.constant 0 : i32
    return %c0_i32, %c0_i32_0 : i32, i32
  }
  func.func @transform_6(%arg0: i32) -> (i32, i32) {
    %c0_i32 = arith.constant 0 : i32
    %c0_i32_0 = arith.constant 0 : i32
    %c0_i32_1 = arith.constant 0 : i32
    return %c0_i32, %c0_i32_0 : i32, i32
  }
  func.func @transform_7(%arg0: i32) -> (i32, i32) {
    %c0_i32 = arith.constant 0 : i32
    %c0_i32_0 = arith.constant 0 : i32
    %c0_i32_1 = arith.constant 0 : i32
    return %c0_i32, %c0_i32_0 : i32, i32
  }
  func.func @transform_8(%arg0: i32) -> (i32, i32) {
    %c0_i32 = arith.constant 0 : i32
    %c0_i32_0 = arith.constant 0 : i32
    %c0_i32_1 = arith.constant 0 : i32
    return %c0_i32, %c0_i32_0 : i32, i32
  }
  func.func @transform_9(%arg0: i32) -> (i32, i32) {
    %c0_i32 = arith.constant 0 : i32
    %c0_i32_0 = arith.constant 0 : i32
    %c0_i32_1 = arith.constant 0 : i32
    return %c0_i32, %c0_i32_0 : i32, i32
  }
  func.func @transform_10(%arg0: i32) -> (i32, i32) {
    %c0_i32 = arith.constant 0 : i32
    %c0_i32_0 = arith.constant 0 : i32
    %c0_i32_1 = arith.constant 0 : i32
    return %c0_i32, %c0_i32_0 : i32, i32
  }
  func.func @transform_11(%arg0: i32) -> (i32, i32) {
    %c0_i32 = arith.constant 0 : i32
    %c0_i32_0 = arith.constant 0 : i32
    %c0_i32_1 = arith.constant 0 : i32
    return %c0_i32, %c0_i32_0 : i32, i32
  }
  func.func @transform_12(%arg0: i32) -> (i32, i32) {
    %c0_i32 = arith.constant 0 : i32
    %c0_i32_0 = arith.constant 0 : i32
    %c0_i32_1 = arith.constant 0 : i32
    return %c0_i32, %c0_i32_0 : i32, i32
  }
  func.func @transform_13(%arg0: i32) -> (i32, i32) {
    %c0_i32 = arith.constant 0 : i32
    %c0_i32_0 = arith.constant 0 : i32
    %c0_i32_1 = arith.constant 0 : i32
    return %c0_i32, %c0_i32_0 : i32, i32
  }
  func.func @transform_14(%arg0: i32) -> (i32, i32) {
    %c0_i32 = arith.constant 0 : i32
    %c0_i32_0 = arith.constant 0 : i32
    %c0_i32_1 = arith.constant 0 : i32
    return %c0_i32, %c0_i32_0 : i32, i32
  }
  func.func @transform_15(%arg0: i32) -> (i32, i32) {
    %c0_i32 = arith.constant 0 : i32
    %c0_i32_0 = arith.constant 0 : i32
    %c0_i32_1 = arith.constant 0 : i32
    return %c0_i32, %c0_i32_0 : i32, i32
  }
}

</mosaic_0001>

<bundles_post_ra>
// kernel: tpu_custom_call.1
= control target key start
LH: loop header
LB: loop body
LE: loop exit
PB: predicated region body
PF: predicated region fallthrough
CT: control target
= control target key end

     0   :  { %s2235_s0 = inlined_call_operand.hbm [shape: f32[16,256], index: 0, kind: input, shape index: {}]   ;;  %s2236_s1 = inlined_call_operand.hbm [shape: bf16[256,128], index: 1, kind: input, shape index: {}]   ;;  %s2237_s2 = inlined_call_operand.vmem [shape: f32[1,128], index: 2, kind: input, shape index: {}]   ;;  %s2238_s3 = inlined_call_operand.vmem [shape: f32[1,128], index: 3, kind: input, shape index: {}]   ;;  %s2239_s4 = inlined_call_operand.vmem [shape: f32[1,128], index: 4, kind: input, shape index: {}]   ;;  %s2240_s5 = inlined_call_operand.hbm [shape: bf16[128,128], index: 5, kind: input, shape index: {}]   ;;  %s2241_s6 = inlined_call_operand.vmem [shape: f32[1,128], index: 6, kind: input, shape index: {}]   ;;  %s2242_s7 = inlined_call_operand.vmem [shape: f32[1,128], index: 7, kind: input, shape index: {}]   ;;  %s2243_s8 = inlined_call_operand.vmem [shape: f32[1,128], index: 8, kind: input, shape index: {}]   ;;  %s2244_s9 = inlined_call_operand.hbm [shape: bf16[128,128], index: 9, kind: input, shape index: {}]   ;;  %s2245_s10 = inlined_call_operand.vmem [shape: f32[1,128], index: 10, kind: input, shape index: {}]   ;;  %s2246_s11 = inlined_call_operand.vmem [shape: f32[1,128], index: 11, kind: input, shape index: {}]   ;;  %s2247_s12 = inlined_call_operand.vmem [shape: f32[1,128], index: 12, kind: input, shape index: {}]   ;;  %s2248_s13 = inlined_call_operand.hbm [shape: bf16[128,128], index: 13, kind: input, shape index: {}]   ;;  %s2249_s14 = inlined_call_operand.vmem [shape: f32[1,128], index: 14, kind: input, shape index: {}]   ;;  %s2250_s15 = inlined_call_operand.hbm [shape: f32[16,128], index: 15, kind: output, shape index: {}]  }
   0x1   :  { %2258 = sst [smem:[#allocation21_spill]] %s2235_s0 }
   0x2   :  { %2259 = sst [smem:[#allocation22_spill]] %s2240_s5 }
   0x3   :  { %2260 = sst [smem:[#allocation23_spill]] %s2244_s9 }
   0x4   :  { %2261 = sst [smem:[#allocation24_spill]] %s2246_s11 }
   0x5   :  { %2262 = sst [smem:[#allocation25_spill]] %s2247_s12 }
   0x6   :  { %2263 = sst [smem:[#allocation26_spill]] %s2248_s13 }
   0x7   :  { %2264 = sst [smem:[#allocation27_spill]] %s2249_s14 }
   0x8   :  { %2265 = sst [smem:[#allocation28_spill]] %s2250_s15 }
   0x9   :  { %20 = vsyncpa [#allocation4], 0 }
   0xa   :  { %22 = vsyncpa [#allocation4 + $0x1], 0 }
   0xb   :  { %23 = vsyncpa [#allocation7], 0 }
   0xc   :  { %25 = vsyncpa [#allocation7 + $0x1], 0 }
   0xd   :  { %26 = vsyncpa [#allocation10], 0 }
   0xe   :  { %27 = vsyncpa [#allocation5], 0  ;;  %s1933_s18 = smov 0   ;;  %s1935_s19 = smov 0  }
   0xf   :  { %s1937_s20 = smov 0   ;;  %s1939_s21 = smov 0  }
  0x10 LB: > { %2266 = sst [smem:[#allocation18_spill]] %s1829_s20  ;;  %s1952_s22 = sadd.s32 4294967295, %s1833_s21   ;;  %s1833_s21 = sphi %s1939_s21, %s2290_s21   ;;  %s1829_s20 = sphi %s1937_s20, %s2292_s20   ;;  %s1825_s19 = sphi %s1935_s19, %s2294_s19   ;;  %s1821_s18 = sphi %s1933_s18, %s2293_s18  }
  0x11   : > { %s1955_s23 = sadd.s32 1, %s1833_s21   ;;  %s40_s25 = sadd.s32 1, %s1829_s20 }
  0x12   : > { %2267 = sst [smem:[#allocation19_spill]] %s1955_s23  ;;  %s37_s24 = ssub.s32 %s1833_s21, %s1955_s23 }
  0x13   : > { %p38_p0 = scmp.eq.s32.totalorder %s37_s24, 0  ;;  %p47_p1 = scmp.ne.s32.totalorder %s1829_s20, %s1825_s19 }
  0x14   : > { %p48_p2 = scmp.eq.s32.totalorder %s1833_s21, 0  ;;  %p53_p3 = scmp.ne.s32.totalorder %s1825_s19, %s1821_s18 }
  0x15   : > { %s1965_s26 = scalar_select %p38_p0, %s1829_s20, %s40_s25  }
  0x16   : > { %p1967_p4 = por %p48_p2, %p47_p1  ;;  %p2251_p5 = scmp.eq.s32.totalorder %s1952_s22, 0 }
  0x17   : > { %2268 = sst [smem:[#allocation20_spill]] %s1965_s26  ;;  %p1314_p6 = scmp.ge.s32.totalorder %s1833_s21, 1 }
  0x18   : > { %p384_p7 = scmp.lt.s32.totalorder %s1833_s21, 3  ;;  %p1976_p8 = por %p2251_p5, %p53_p3 }
  0x19   : > { %s1835_s30 = smov [#allocation8]   ;;  %p1529_p13 = scmp.lt.s32.totalorder %s1833_s21, 2 }
  0x1a   : > { %s2270_s28 = scalar_select %p1976_p8, 1, 0 }
  0x1b   : > { %p1981_p10 = pnand %p1314_p6, %p384_p7  ;;  %s405_s16 = sshll.u32 %s1835_s30, 4  ;;  %s406_s16 = int_to_ptr.vmem [resolvable:$true] %s405_s16 }
  0x1c   : > { %p1996_p0 = pnand %p1529_p13, %p1967_p4  ;;  %s1636_s24 = scalar_lea.vmem %s406_s16, 1024 }
  0x1d   : > { %p1509_p11 = pneg %p1981_p10  ;;  %p1637_p2 = scmp.ne.s32.totalorder %s406_s16, %s1636_s24 }
  0x1e   : > { %p1644_p7 = scmp.lt.s32.totalorder %s406_s16, %s406_s16 }
  0x1f   : > { %p1989_p12 = pnand %p1509_p11, %p2251_p5  ;;  %p1645_p11 = scmp.lt.s32.totalorder %s1636_s24, %s1636_s24 }
  0x21   : > { %p1627_p1 = pneg %p1989_p12  ;;  %p1646_p9 = por %p1645_p11, %p1644_p7 }
  0x23   : > { %p1639_p3 = pnand %p1637_p2, %p1627_p1 }
  0x25   : > { %p1640_p6 = pneg %p1639_p3 }
  0x27   : > { %p1647_p5 = pnand %p1646_p9, %p1640_p6 }
  0x29   : > { %1650 = shalt.err (!%p1647_p5)
}
  0x2a   : > { %s2254_s25 = smov 64   ;;  %s2256_s27 = smov 4  }
  0x2b   : > { %s2274_s5 = sld [smem:[#allocation22_spill]]  ;;  %s1838_s23 = smov [#allocation9]  }
  0x2c   : > { %s427_s15 = sshll.u32 %s1838_s23, 4  ;;  %s1839_s14 = smov [#allocation11]   ;;  %s428_s15 = int_to_ptr.vmem [resolvable:$true] %s427_s15 }
  0x2d   : > { %s449_s24 = sshll.u32 %s1839_s14, 4  ;;  %s1662_s12 = scalar_lea.vmem %s428_s15, 1024  ;;  %s450_s24 = int_to_ptr.vmem [resolvable:$true] %s449_s24 }
  0x2e   : > { %p1663_p4 = scmp.ne.s32.totalorder %s428_s15, %s1662_s12  ;;  %p1670_p13 = scmp.lt.s32.totalorder %s428_s15, %s428_s15 }
  0x2f   : > { %p1671_p2 = scmp.lt.s32.totalorder %s1662_s12, %s1662_s12 }
  0x30   : > { %p1665_p5 = pnand %p1663_p4, %p1627_p1 }
  0x31   : > { %1512 = dma.hbm_to_vmem [thread:$0]  (!%p1989_p12), %s2274_s5, 1024, %s406_s16, [#allocation7], %s2254_s25, %s2254_s25, %s2256_s27  }
  0x32   : > { %p1666_p9 = pneg %p1665_p5  ;;  %p1672_p3 = por %p1671_p2, %p1670_p13 }
  0x34   : > { %p1673_p6 = pnand %p1672_p3, %p1666_p9 }
  0x36   : > { %1676 = shalt.err (!%p1673_p6)
}
  0x37   : > { %s2275_s9 = sld [smem:[#allocation23_spill]]  ;;  %s2025_s14 = sand.u32 1, %s1829_s20  }
  0x38   : > { %s1688_s16 = scalar_lea.vmem %s450_s24, 1024  ;;  %p1696_p5 = scmp.lt.s32.totalorder %s450_s24, %s450_s24 }
  0x39   : > { %p1689_p7 = scmp.ne.s32.totalorder %s450_s24, %s1688_s16  ;;  %p1697_p9 = scmp.lt.s32.totalorder %s1688_s16, %s1688_s16 }
  0x3b   : > { %p1691_p11 = pnand %p1689_p7, %p1627_p1  ;;  %p1698_p13 = por %p1697_p9, %p1696_p5 }
  0x3d   : > { %1515 = dma.hbm_to_vmem [thread:$0]  (!%p1989_p12), %s2275_s9, 1024, %s428_s15, [#allocation10], %s2254_s25, %s2254_s25, %s2256_s27  }
  0x3e   : > { %p1692_p4 = pneg %p1691_p11 }
  0x40   : > { %p1699_p2 = pnand %p1698_p13, %p1692_p4 }
  0x42   : > { %1702 = shalt.err (!%p1699_p2)
}
  0x43   : > { %s2276_s13 = sld [smem:[#allocation26_spill]]  ;;  %s1319_s30 = sshll.u32 %s2025_s14, 4 }
  0x44   : > { %s1320_s23 = sshll.u32 %s1833_s21, 7  ;;  %s2277_s0 = sld [smem:[#allocation21_spill]] }
  0x45   : > { %s470_s17 = scalar_lea.vmem [#allocation3], %s1319_s30  ;;  %s467_s12 = scalar_lea.sflag [#allocation4], %s2025_s14 }
  0x46   : > { %s476_s9 = sshll.u32 %s470_s17, 4  ;;  %p1705_p3 = pneg %p1996_p0  ;;  %s2045_s9 = int_to_ptr.vmem [resolvable:$true] %s476_s9 }
  0x49   : > { %1518 = dma.hbm_to_vmem [thread:$0]  (!%p1989_p12), %s2276_s13, 1024, %s450_s24, [#allocation10], %s2254_s25, %s2254_s25, %s2256_s27  }
  0x4a   : > { %s2043_s5 = scalar_lea.hbm %s2277_s0, %s1320_s23  ;;  %s1708_s23 = scalar_lea.hbm %s2277_s0, 512 }
  0x4b   : > { %s1703_s15 = scalar_lea.hbm %s2043_s5, 256  ;;  %p1709_p7 = scmp.lt.s32.totalorder %s2043_s5, %s2277_s0 }
  0x4c   : > { %p1704_p1 = scmp.ne.s32.totalorder %s2043_s5, %s1703_s15  ;;  %p1710_p11 = scmp.lt.s32.totalorder %s1708_s23, %s1703_s15 }
  0x4e   : > { %p1706_p12 = pnand %p1705_p3, %p1704_p1  ;;  %p1711_p4 = por %p1710_p11, %p1709_p7 }
  0x50   : > { %p1707_p6 = pneg %p1706_p12 }
  0x52   : > { %p1712_p5 = pnand %p1711_p4, %p1707_p6 }
  0x54   : > { %1715 = shalt.err (!%p1712_p5)
}
  0x55   : > { %s1716_s30 = scalar_lea.vmem %s2045_s9, 256  ;;  %s1840_s17 = smov [#allocation3]  }
  0x56   : > { %p1717_p9 = scmp.ne.s32.totalorder %s2045_s9, %s1716_s30  ;;  %s1721_s24 = sshll.u32 %s1840_s17, 4  ;;  %s1722_s24 = int_to_ptr.vmem [resolvable:$false] %s1721_s24 }
  0x57   : > { %s1723_s26 = scalar_lea.vmem %s1722_s24, 512  ;;  %p1724_p1 = scmp.lt.s32.totalorder %s2045_s9, %s1722_s24 }
  0x58   : > { %p1719_p13 = pnand %p1717_p9, %p1705_p3  ;;  %p1725_p12 = scmp.lt.s32.totalorder %s1723_s26, %s1716_s30 }
  0x5a   : > { %p1720_p2 = pneg %p1719_p13  ;;  %p1726_p8 = por %p1725_p12, %p1724_p1 }
  0x5c   : > { %p1727_p7 = pnand %p1726_p8, %p1720_p2 }
  0x5e   : > { %1730 = shalt.err (!%p1727_p7)
}
  0x5f   : > { %s1841_s25 = smov 256   ;;  %s1842_s15 = smov 128  }
  0x60   : > { %s1843_s23 = smov 8   ;;  %s486_s16 = sand.u32 1, %s1833_s21  }
  0x61   : > { %1522 = dma.hbm_to_vmem [thread:$0]  (!%p1996_p0), %s2043_s5, 256, %s2045_s9, %s467_s12, %s1841_s25, %s1842_s15, %s1843_s23  }
  0x62   : > { %s1321_s17 = sshll.u32 %s2025_s14, 6  ;;  %s1372_s30 = sshll.u32 %s1833_s21, 10 }
  0x63   : > { %s490_s24 = scalar_lea.vmem [#allocation6], %s1321_s17  ;;  %s2080_s13 = scalar_lea.hbm %s2236_s1, %s1372_s30 }
  0x64   : > { %s497_s26 = sshll.u32 %s490_s24, 4  ;;  %s487_s20 = scalar_lea.sflag [#allocation7], %s486_s16  ;;  %s2082_s26 = int_to_ptr.vmem [resolvable:$true] %s497_s26 }
  0x65   : > { %s1731_s11 = scalar_lea.hbm %s2080_s13, 1024  ;;  %s1736_s21 = scalar_lea.hbm %s2236_s1, 2048 }
  0x66   : > { %p1732_p8 = scmp.ne.s32.totalorder %s2080_s13, %s1731_s11  ;;  %p1737_p4 = scmp.lt.s32.totalorder %s2080_s13, %s2236_s1 }
  0x67   : > { %p1738_p5 = scmp.lt.s32.totalorder %s1736_s21, %s1731_s11 }
  0x68   : > { %p1734_p6 = pnand %p1732_p8, %p1705_p3 }
  0x69   : > { %p1739_p9 = por %p1738_p5, %p1737_p4 }
  0x6a   : > { %p1735_p11 = pneg %p1734_p6 }
  0x6c   : > { %p1740_p13 = pnand %p1739_p9, %p1735_p11 }
  0x6e   : > { %1743 = shalt.err (!%p1740_p13)
}
  0x6f   : > { %s1744_s27 = scalar_lea.vmem %s2082_s26, 1024  ;;  %s1844_s12 = smov [#allocation6]  }
  0x70   : > { %p1745_p2 = scmp.ne.s32.totalorder %s2082_s26, %s1744_s27  ;;  %s1749_s25 = sshll.u32 %s1844_s12, 4  ;;  %s1750_s25 = int_to_ptr.vmem [resolvable:$false] %s1749_s25 }
  0x71   : > { %s1751_s15 = scalar_lea.vmem %s1750_s25, 2048  ;;  %p1752_p7 = scmp.lt.s32.totalorder %s2082_s26, %s1750_s25 }
  0x72   : > { %p1747_p1 = pnand %p1745_p2, %p1705_p3  ;;  %p1753_p8 = scmp.lt.s32.totalorder %s1751_s15, %s1744_s27 }
  0x74   : > { %p1748_p12 = pneg %p1747_p1  ;;  %p1754_p6 = por %p1753_p8, %p1752_p7 }
  0x76   : > { %p1755_p4 = pnand %p1754_p6, %p1748_p12 }
  0x78   : > { %1758 = shalt.err (!%p1755_p4)
}
  0x79   : > { %s2278_s11 = smov 4   ;;  %s2279_s23 = smov 64  }
  0x7a   : > { %1525 = dma.hbm_to_vmem [thread:$0]  (!%p1996_p0), %s2080_s13, 1024, %s2082_s26, %s487_s20, %s2279_s23, %s2279_s23, %s2278_s11  }
  0x7b   : > { %509 = sbr.rel (%p1981_p10) target bundleno = 1160 (0x488), region = 80  ;;  %s511_s16 = sand.u32 (!%p1981_p10), 1, %s1825_s19  }
  0x7c   : > { %s1325_s17 = sshll.u32 (!%p1981_p10), %s511_s16, 4  ;;  %s512_s30 = scalar_lea.sflag (!%p1981_p10), [#allocation4], %s511_s16 }
  0x7d   : > { %s515_s24 = scalar_lea.vmem (!%p1981_p10), [#allocation3], %s1325_s17  ;;  %p2280_p3 = scmp.ne.s32.totalorder (!%p1981_p10), %s2270_s28, 0 }
  0x80   : > { %1800 = dma.done.wait (%p2280_p3), %s512_s30, 256  }
  0x81   : > { %1802 = vsyncadd (%p2280_p3), %s512_s30, 4294967040  ;;  %s520_s18 = sand.u32 1, %s1952_s22   ;;  %s1326_s5 = sshll.u32 %s511_s16, 6 }
  0x82   : > { %s521_s9 = scalar_lea.sflag [#allocation7], %s520_s18  ;;  %s2117_s13 = scalar_lea.vmem [#allocation6], %s1326_s5 }
  0x83   : > { %1804 = dma.done.wait (%p2280_p3), %s521_s9, 1024  }
  0x84   : > { %1806 = vsyncadd (%p2280_p3), %s521_s9, 4294966272  ;;  %p2281_p10 = scmp.eq.s32.totalorder %s1952_s22, 0 }
  0x86   : > { %1808 = dma.done.wait (%p2281_p10), [#allocation7], 1024   ;;  %p2282_p0 = pmov %p2281_p10 }
  0x88   : > { %1810 = vsyncadd (%p2282_p0), [#allocation7], 4294966272  ;;  %p2283_p11 = pmov %p2282_p0 }
  0x89   : > { %p2284_p5 = pmov %p2282_p0 }
  0x8a   : > { %1812 = dma.done.wait (%p2283_p11), [#allocation10], 2048  }
  0x8b   : > { %1814 = vsyncadd (%p2284_p5), [#allocation10], 4294965248  ;;  %p2285_p9 = scmp.ne.s32.totalorder %s1952_s22, 0 }
  0x8d   : > { %588 = sbr.rel (%p2285_p9) target bundleno = 148 (0x94), region = 104 }
  0x92   : > { %v1845_v0 = vmov 0.0  }
  0x93   : > { %589 = vst [vmem:[#allocation2] sm:$0xff] %v1845_v0  ;;  %590 = vst [vmem:[#allocation2 + $0x8] sm:$0xff] %v1845_v0 }
  0x94 PF: > { %v1583_v1 = vld [vmem:[%s2117_s13 + $0x38] sm:$0xff]   ;;  %v1846_v2 = vmov 0.0   ;;  %v1584_v3 = vld [vmem:[%s2117_s13 + $0x30] sm:$0xff]   ;;  %vm1847_vm0 = vmmov 0   ;;  %v1585_v4 = vld [vmem:[%s2117_s13 + $0x28] sm:$0xff]   ;;  %p1339_p13 = scmp.ne.s32.totalorder %s1952_s22, 1 }
  0x95   : > { %1409 = vmatprep.subr.bf16.mxu0 %v1846_v2  ;;  %1425 = vmatprep.mubr.msk.bf16.mxu0 %vm1847_vm0, %v1846_v2  ;;  %v591_v5 = vld [vmem:[%s515_s24] sm:$0xff]  ;;  %v592_v6 = vld [vmem:[%s515_s24 + $0x8] sm:$0xff]  ;;  %s2286_s24 = sld [smem:[#allocation24_spill]] (!%p1339_p13) }
  0x96   : > { %1410 = vmatpush3.bf16.msra.mxu0 %v1583_v1  ;;  %v593_v7 = vadd.f32 1.0, %v591_v5  ;;  %v594_v8 = vadd.f32 1.0, %v592_v6  ;;  %v1586_v9 = vld [vmem:[%s2117_s13 + $0x20] sm:$0xff]   ;;  %v1587_v10 = vld [vmem:[%s2117_s13 + $0x18] sm:$0xff]   ;;  %v1588_v11 = vld [vmem:[%s2117_s13 + $0x10] sm:$0xff]   ;;  %s2287_s9 = sld [smem:[#allocation25_spill]] (!%p1339_p13) }
  0x97   : > { %1411 = vmatprep.subr.bf16.mxu0 %v1846_v2  ;;  %v1589_v12 = vld [vmem:[%s2117_s13 + $0x8] sm:$0xff]   ;;  %v1590_v16 = vld [vmem:[%s2117_s13] sm:$0xff]   ;;  %s2288_s28 = sld [smem:[#allocation27_spill]] (!%p1339_p13) }
  0x98   : > { %1591 = vlog2.f32 %v593_v7 }
  0x99   : > { %1593 = vlog2.f32 %v594_v8 }
  0x9a   : > { %1412 = vmatpush3.bf16.msra.mxu0 %v1584_v3  ;;  %v599_v19 = vld [vmem:[#allocation2] sm:$0xff]  ;;  %v600_v23 = vld [vmem:[#allocation2 + $0x8] sm:$0xff] }
  0x9b   : > { %1413 = vmatprep.subr.bf16.mxu0 %v1846_v2 }
  0x9e   : > { %1414 = vmatpush3.bf16.msra.mxu0 %v1585_v4 }
  0x9f   : > { %1415 = vmatprep.subr.bf16.mxu0 %v1846_v2 }
  0xa2   : > { %1416 = vmatpush3.bf16.msra.mxu0 %v1586_v9 }
  0xa3   : > { %1417 = vmatprep.subr.bf16.mxu0 %v1846_v2 }
  0xa5   : > { %v1592_v13 = vpop.eup %1591 }
  0xa6   : > { %1418 = vmatpush3.bf16.msra.mxu0 %v1587_v10  ;;  %v1594_v14 = vpop.eup %1593  ;;  %v596_v15 = vmul.f32 0.6931472, %v1592_v13 }
  0xa7   : > { %1419 = vmatprep.subr.bf16.mxu0 %v1846_v2  ;;  %v598_v17 = vmul.f32 0.6931472, %v1594_v14 }
  0xa9   : > { %v601_v18 = vpack.c.bf16 %v598_v17, %v596_v15 }
  0xaa   : > { %1420 = vmatpush3.bf16.msra.mxu0 %v1588_v11 }
  0xab   : > { %1421 = vmatprep.subr.bf16.mxu0 %v1846_v2 }
  0xae   : > { %1422 = vmatpush3.bf16.msra.mxu0 %v1589_v12 }
  0xaf   : > { %1423 = vmatprep.subr.bf16.mxu0 %v1846_v2 }
  0xb2   : > { %1424 = vmatpush3.bf16.msra.mxu0 %v1590_v16 }
  0xb5   : > { %1426 = vmatmul.mubr.bf16.vlgmr.msra.gmra.mxu0 %v601_v18 }
 0x175   : > { %v700_v20 = vpop.f32.mrf.mxu0 }
 0x176   : > { %v707_v21 = vadd.f32 %v700_v20, %v599_v19 }
 0x177   : > { %v1427_v22 = vpop.f32.mrf.mxu0 }
 0x178   : > { %709 = vst [vmem:[#allocation2] sm:$0xff] %v707_v21  ;;  %714 = sbr.rel (%p1339_p13) target bundleno = 1138 (0x472), region = 108 }
 0x179   : > { %v703_v24 = vpop.f32.mrf.mxu0 }
 0x17a   : > { %v708_v25 = vadd.f32 %v703_v24, %v600_v23 }
 0x17b   : > { %v1428_v26 = vpop.f32.mrf.mxu0 }
 0x17c   : > { %710 = vst [vmem:[#allocation2 + $0x8] sm:$0xff] %v708_v25 }
 0x17d   : > { %v1595_v27 = vld [vmem:[#allocation8 + $0x38] sm:$0xff]   ;;  %v1848_v28 = vmov 0.0   ;;  %v1596_v29 = vld [vmem:[#allocation8 + $0x30] sm:$0xff]   ;;  %vm1849_vm1 = vmmov 0   ;;  %v1597_v30 = vld [vmem:[#allocation8 + $0x28] sm:$0xff]   ;;  %v755_v62 = vlaneseq }
 0x17e   : > { %1429 = vmatprep.subr.bf16.mxu0 %v1848_v28  ;;  %1449 = vmatprep.subr.bf16.mxu1 %v1848_v28  ;;  %v1340_v33 = vld [vmem:[%s2237_s2] ss:$0 sm:$0xff]  ;;  %v1598_v34 = vld [vmem:[#allocation8 + $0x20] sm:$0xff]   ;;  %v1599_v40 = vld [vmem:[#allocation8 + $0x18] sm:$0xff]  }
 0x17f   : > { %1430 = vmatpush3.bf16.msra.mxu0 %v1595_v27  ;;  %1445 = vmatprep.mubr.msk.bf16.mxu0 %vm1849_vm1, %v1848_v28  ;;  %v715_v31 = vld [vmem:[#allocation2] sm:$0xff]  ;;  %v1601_v52 = vld [vmem:[#allocation8 + $0x8] sm:$0xff]   ;;  %v1602_v57 = vld [vmem:[#allocation8] sm:$0xff]   ;;  %v756_v63 = vshrl.u32 %v755_v62, 7 }
 0x180   : > { %1431 = vmatprep.subr.bf16.mxu0 %v1848_v28  ;;  %1465 = vmatprep.mubr.msk.bf16.mxu1 %vm1849_vm1, %v1848_v28  ;;  %v724_v35 = vadd.f32 %v1340_v33, %v715_v31  ;;  %v1600_v45 = vld [vmem:[#allocation8 + $0x10] sm:$0xff]   ;;  %v1603_v16 = vld [vmem:[#allocation9 + $0x38] sm:$0xff]   ;;  %v1605_v18 = vld [vmem:[#allocation9 + $0x28] sm:$0xff]  }
 0x181   : > { %v747_v0 = vld [vmem:[%s2238_s3] sm:$0x1]  ;;  %v2162_v1 = vsub.s32 0, %v756_v63  ;;  %1450 = vmatpush3.bf16.msra.mxu1 %v1603_v16  ;;  %v1606_v19 = vld [vmem:[#allocation9 + $0x20] sm:$0xff]   ;;  %v1607_v20 = vld [vmem:[#allocation9 + $0x18] sm:$0xff]  }
 0x182   : > { %v735_v38 = vmul.f32 %v724_v35, %v724_v35  ;;  %v751_v4 = vld [vmem:[%s2239_s4] sm:$0x1]  ;;  %1451 = vmatprep.subr.bf16.mxu1 %v1848_v28  ;;  %v1609_v22 = vld [vmem:[#allocation9 + $0x8] sm:$0xff]   ;;  %v1610_v23 = vld [vmem:[#allocation9] sm:$0xff]  }
 0x183   : > { %1432 = vmatpush3.bf16.msra.mxu0 %v1596_v29  ;;  %v716_v32 = vld [vmem:[#allocation2 + $0x8] sm:$0xff]  ;;  %v1604_v17 = vld [vmem:[#allocation9 + $0x30] sm:$0xff]  }
 0x184   : > { %1433 = vmatprep.subr.bf16.mxu0 %v1848_v28  ;;  %v725_v36 = vadd.f32 %v1340_v33, %v716_v32  ;;  %v1608_v21 = vld [vmem:[#allocation9 + $0x10] sm:$0xff]  }
 0x185   : > { %1452 = vmatpush3.bf16.msra.mxu1 %v1604_v17  ;;  %v1341_v24 = vld [vmem:[%s2241_s6] ss:$0 sm:$0xff] }
 0x186   : > { %v726_v37 = vadd.f32 %v725_v36, %v724_v35  ;;  %v736_v39 = vmul.f32 %v725_v36, %v725_v36  ;;  %1453 = vmatprep.subr.bf16.mxu1 %v1848_v28 }
 0x187   : > { %1434 = vmatpush3.bf16.msra.mxu0 %v1597_v30 }
 0x188   : > { %1435 = vmatprep.subr.bf16.mxu0 %v1848_v28  ;;  %v727_v41 = vrot.slane %v726_v37, 4  ;;  %v737_v42 = vadd.f32 %v736_v39, %v735_v38 }
 0x189   : > { %1454 = vmatpush3.bf16.msra.mxu1 %v1605_v18 }
 0x18a   : > { %v728_v43 = vadd.f32 %v727_v41, %v726_v37  ;;  %v738_v44 = vrot.slane %v737_v42, 4  ;;  %1455 = vmatprep.subr.bf16.mxu1 %v1848_v28 }
 0x18b   : > { %1436 = vmatpush3.bf16.msra.mxu0 %v1598_v34 }
 0x18c   : > { %1437 = vmatprep.subr.bf16.mxu0 %v1848_v28  ;;  %v729_v46 = vrot.slane %v728_v43, 2  ;;  %v739_v47 = vadd.f32 %v738_v44, %v737_v42 }
 0x18d   : > { %1456 = vmatpush3.bf16.msra.mxu1 %v1606_v19 }
 0x18e   : > { %v730_v48 = vadd.f32 %v729_v46, %v728_v43  ;;  %v740_v49 = vrot.slane %v739_v47, 2  ;;  %1457 = vmatprep.subr.bf16.mxu1 %v1848_v28 }
 0x18f   : > { %1438 = vmatpush3.bf16.msra.mxu0 %v1599_v40 }
 0x190   : > { %1439 = vmatprep.subr.bf16.mxu0 %v1848_v28  ;;  %v731_v50 = vrot.slane %v730_v48, 1  ;;  %v741_v51 = vadd.f32 %v740_v49, %v739_v47 }
 0x191   : > { %1458 = vmatpush3.bf16.msra.mxu1 %v1607_v20 }
 0x192   : > { %v732_v53 = vadd.f32 %v731_v50, %v730_v48  ;;  %v742_v54 = vrot.slane %v741_v51, 1  ;;  %1459 = vmatprep.subr.bf16.mxu1 %v1848_v28 }
 0x193   : > { %1440 = vmatpush3.bf16.msra.mxu0 %v1600_v45 }
 0x194   : > { %1441 = vmatprep.subr.bf16.mxu0 %v1848_v28  ;;  %v734_v55 = vmul.f32 0.0625, %v732_v53  ;;  %v743_v56 = vadd.f32 %v742_v54, %v741_v51  ;;  %v905_v53 = vld [vmem:[%s2242_s7] sm:$0x1] }
 0x195   : > { %1460 = vmatpush3.bf16.msra.mxu1 %v1608_v21 }
 0x196   : > { %v744_v58 = vmul.f32 0.0625, %v743_v56  ;;  %v745_v59 = vmul.f32 %v734_v55, %v734_v55  ;;  %1461 = vmatprep.subr.bf16.mxu1 %v1848_v28  ;;  %v909_v56 = vld [vmem:[%s2243_s8] sm:$0x1] }
 0x197   : > { %1442 = vmatpush3.bf16.msra.mxu0 %v1601_v52 }
 0x198   : > { %1443 = vmatprep.subr.bf16.mxu0 %v1848_v28  ;;  %v746_v60 = vsub.f32 %v744_v58, %v745_v59 }
 0x199   : > { %1462 = vmatpush3.bf16.msra.mxu1 %v1609_v22 }
 0x19a   : > { %v748_v61 = vadd.f32 0.001, %v746_v60  ;;  %1463 = vmatprep.subr.bf16.mxu1 %v1848_v28 }
 0x19b   : > { %1444 = vmatpush3.bf16.msra.mxu0 %v1602_v57 }
 0x19c   : > { %1469 = vmatprep.subr.bf16.mxu0 %v1848_v28  ;;  %1619 = vrsqrt.f32 %v748_v61 }
 0x19d   : > { %1464 = vmatpush3.bf16.msra.mxu1 %v1610_v23 }
 0x1a9   : > { %v1620_v2 = vpop.eup %1619 }
 0x1aa   : > { %v750_v3 = vmul.f32 %v1620_v2, %v747_v0 }
 0x1ac   : > { %v752_v5 = vmul.f32 %v750_v3, %v734_v55  ;;  %v758_v6 = vrot.slane %v750_v3, %v2162_v1 }
 0x1ae   : > { %v753_v7 = vsub.f32 %v751_v4, %v752_v5  ;;  %v760_v8 = vmul.f32 %v758_v6, %v724_v35  ;;  %v761_v9 = vmul.f32 %v758_v6, %v725_v36  ;;  %v1611_v5 = vld [vmem:[#allocation11 + $0x38] sm:$0xff]   ;;  %v1612_v6 = vld [vmem:[#allocation11 + $0x30] sm:$0xff]  }
 0x1b0   : > { %v766_v10 = vrot.slane %v753_v7, %v2162_v1  ;;  %v1613_v7 = vld [vmem:[#allocation11 + $0x28] sm:$0xff]  }
 0x1b2   : > { %v768_v11 = vadd.f32 %v766_v10, %v760_v8  ;;  %v769_v12 = vadd.f32 %v766_v10, %v761_v9  ;;  %v1614_v8 = vld [vmem:[#allocation11 + $0x20] sm:$0xff]   ;;  %v1615_v9 = vld [vmem:[#allocation11 + $0x18] sm:$0xff]   ;;  %v1616_v10 = vld [vmem:[#allocation11 + $0x10] sm:$0xff]  }
 0x1b4   : > { %v770_v13 = vmax.f32 %v768_v11, 0.0  ;;  %v771_v14 = vmax.f32 %v769_v12, 0.0  ;;  %v1617_v11 = vld [vmem:[#allocation11 + $0x8] sm:$0xff]   ;;  %v1618_v12 = vld [vmem:[#allocation11] sm:$0xff]  }
 0x1b6   : > { %v772_v15 = vpack.c.bf16 %v771_v14, %v770_v13  ;;  %v1350_v13 = vld [vmem:[%s2245_s10] ss:$0 sm:$0xff] }
 0x1b8   : > { %1446 = vmatmul.mubr.bf16.vlgmr.msra.gmra.mxu0 %v772_v15 }
 0x1b9   : > { %1485 = vmatprep.mubr.msk.bf16.mxu0 %vm1849_vm1, %v1848_v28  ;;  %1470 = vmatpush3.bf16.msra.mxu0 %v1611_v5 }
 0x1ba   : > { %1471 = vmatprep.subr.bf16.mxu0 %v1848_v28 }
 0x1bd   : > { %1472 = vmatpush3.bf16.msra.mxu0 %v1612_v6 }
 0x1be   : > { %1473 = vmatprep.subr.bf16.mxu0 %v1848_v28 }
 0x1c1   : > { %1474 = vmatpush3.bf16.msra.mxu0 %v1613_v7 }
 0x1c2   : > { %1475 = vmatprep.subr.bf16.mxu0 %v1848_v28 }
 0x1c5   : > { %1476 = vmatpush3.bf16.msra.mxu0 %v1614_v8 }
 0x1c6   : > { %1477 = vmatprep.subr.bf16.mxu0 %v1848_v28 }
 0x1c9   : > { %1478 = vmatpush3.bf16.msra.mxu0 %v1615_v9 }
 0x1ca   : > { %1479 = vmatprep.subr.bf16.mxu0 %v1848_v28 }
 0x1cd   : > { %1480 = vmatpush3.bf16.msra.mxu0 %v1616_v10 }
 0x1ce   : > { %1481 = vmatprep.subr.bf16.mxu0 %v1848_v28 }
 0x1d1   : > { %1482 = vmatpush3.bf16.msra.mxu0 %v1617_v11 }
 0x1d2   : > { %1483 = vmatprep.subr.bf16.mxu0 %v1848_v28 }
 0x1d5   : > { %1484 = vmatpush3.bf16.msra.mxu0 %v1618_v12 }
 0x278   : > { %v878_v25 = vpop.f32.mrf.mxu0 }
 0x279   : > { %v879_v27 = vadd.f32 %v1341_v24, %v878_v25 }
 0x27a   : > { %v1447_v26 = vpop.f32.mrf.mxu0 }
 0x27b   : > { %v893_v32 = vmul.f32 %v879_v27, %v879_v27 }
 0x27c   : > { %v881_v29 = vpop.f32.mrf.mxu0 }
 0x27d   : > { %v882_v30 = vadd.f32 %v1341_v24, %v881_v29 }
 0x27e   : > { %v1448_v31 = vpop.f32.mrf.mxu0 }
 0x27f   : > { %v885_v33 = vadd.f32 %v882_v30, %v879_v27  ;;  %v894_v34 = vmul.f32 %v882_v30, %v882_v30 }
 0x281   : > { %v886_v35 = vrot.slane %v885_v33, 4  ;;  %v895_v36 = vadd.f32 %v894_v34, %v893_v32 }
 0x283   : > { %v887_v37 = vadd.f32 %v886_v35, %v885_v33  ;;  %v896_v38 = vrot.slane %v895_v36, 4 }
 0x285   : > { %v888_v39 = vrot.slane %v887_v37, 2  ;;  %v897_v40 = vadd.f32 %v896_v38, %v895_v36 }
 0x287   : > { %v889_v41 = vadd.f32 %v888_v39, %v887_v37  ;;  %v898_v42 = vrot.slane %v897_v40, 2 }
 0x289   : > { %v890_v43 = vrot.slane %v889_v41, 1  ;;  %v899_v44 = vadd.f32 %v898_v42, %v897_v40 }
 0x28b   : > { %v891_v45 = vadd.f32 %v890_v43, %v889_v41  ;;  %v900_v46 = vrot.slane %v899_v44, 1  ;;  %v1063_v41 = vld [vmem:[%s2286_s24] sm:$0x1] }
 0x28d   : > { %v892_v47 = vmul.f32 0.0625, %v891_v45  ;;  %v901_v48 = vadd.f32 %v900_v46, %v899_v44  ;;  %v1067_v44 = vld [vmem:[%s2287_s9] sm:$0x1] }
 0x28f   : > { %v902_v49 = vmul.f32 0.0625, %v901_v48  ;;  %v903_v50 = vmul.f32 %v892_v47, %v892_v47 }
 0x291   : > { %v904_v51 = vsub.f32 %v902_v49, %v903_v50 }
 0x293   : > { %v906_v52 = vadd.f32 0.001, %v904_v51 }
 0x295   : > { %1621 = vrsqrt.f32 %v906_v52 }
 0x2a2   : > { %v1622_v54 = vpop.eup %1621 }
 0x2a3   : > { %v908_v55 = vmul.f32 %v1622_v54, %v905_v53 }
 0x2a5   : > { %v910_v57 = vmul.f32 %v908_v55, %v892_v47  ;;  %v916_v58 = vrot.slane %v908_v55, %v2162_v1 }
 0x2a7   : > { %v911_v59 = vsub.f32 %v909_v56, %v910_v57  ;;  %v919_v60 = vmul.f32 %v916_v58, %v882_v30  ;;  %v918_v61 = vmul.f32 %v916_v58, %v879_v27  ;;  %v1359_v56 = vld [vmem:[%s2288_s28] ss:$0 sm:$0xff] }
 0x2a9   : > { %v924_v62 = vrot.slane %v911_v59, %v2162_v1 }
 0x2ab   : > { %v926_v63 = vadd.f32 %v924_v62, %v918_v61  ;;  %v927_v0 = vadd.f32 %v924_v62, %v919_v60 }
 0x2ad   : > { %v928_v2 = vmax.f32 %v926_v63, 0.0  ;;  %v929_v3 = vmax.f32 %v927_v0, 0.0 }
 0x2af   : > { %v930_v4 = vpack.c.bf16 %v929_v3, %v928_v2 }
 0x2b1   : > { %1466 = vmatmul.mubr.bf16.vlgmr.msra.gmra.mxu1 %v930_v4 }
 0x371   : > { %v1036_v14 = vpop.f32.mrf.mxu1 }
 0x372   : > { %v1037_v16 = vadd.f32 %v1350_v13, %v1036_v14 }
 0x373   : > { %v1467_v15 = vpop.f32.mrf.mxu1 }
 0x374   : > { %v1051_v20 = vmul.f32 %v1037_v16, %v1037_v16 }
 0x375   : > { %v1039_v17 = vpop.f32.mrf.mxu1 }
 0x376   : > { %v1040_v18 = vadd.f32 %v1350_v13, %v1039_v17 }
 0x377   : > { %v1468_v19 = vpop.f32.mrf.mxu1 }
 0x378   : > { %v1043_v21 = vadd.f32 %v1040_v18, %v1037_v16  ;;  %v1052_v22 = vmul.f32 %v1040_v18, %v1040_v18 }
 0x37a   : > { %v1044_v23 = vrot.slane %v1043_v21, 4  ;;  %v1053_v24 = vadd.f32 %v1052_v22, %v1051_v20 }
 0x37c   : > { %v1045_v25 = vadd.f32 %v1044_v23, %v1043_v21  ;;  %v1054_v26 = vrot.slane %v1053_v24, 4 }
 0x37e   : > { %v1046_v28 = vrot.slane %v1045_v25, 2  ;;  %v1055_v27 = vadd.f32 %v1054_v26, %v1053_v24 }
 0x380   : > { %v1047_v29 = vadd.f32 %v1046_v28, %v1045_v25  ;;  %v1056_v30 = vrot.slane %v1055_v27, 2 }
 0x382   : > { %v1048_v31 = vrot.slane %v1047_v29, 1  ;;  %v1057_v32 = vadd.f32 %v1056_v30, %v1055_v27 }
 0x384   : > { %v1049_v33 = vadd.f32 %v1048_v31, %v1047_v29  ;;  %v1058_v34 = vrot.slane %v1057_v32, 1 }
 0x386   : > { %v1050_v35 = vmul.f32 0.0625, %v1049_v33  ;;  %v1059_v36 = vadd.f32 %v1058_v34, %v1057_v32 }
 0x388   : > { %v1060_v37 = vmul.f32 0.0625, %v1059_v36  ;;  %v1061_v38 = vmul.f32 %v1050_v35, %v1050_v35 }
 0x38a   : > { %v1062_v39 = vsub.f32 %v1060_v37, %v1061_v38 }
 0x38c   : > { %v1064_v40 = vadd.f32 0.001, %v1062_v39 }
 0x38e   : > { %1623 = vrsqrt.f32 %v1064_v40 }
 0x39b   : > { %v1624_v42 = vpop.eup %1623 }
 0x39c   : > { %v1066_v43 = vmul.f32 %v1624_v42, %v1063_v41 }
 0x39e   : > { %v1068_v45 = vmul.f32 %v1066_v43, %v1050_v35  ;;  %v1074_v46 = vrot.slane %v1066_v43, %v2162_v1 }
 0x3a0   : > { %v1069_v47 = vsub.f32 %v1067_v44, %v1068_v45  ;;  %v1076_v48 = vmul.f32 %v1074_v46, %v1037_v16  ;;  %v1077_v49 = vmul.f32 %v1074_v46, %v1040_v18 }
 0x3a2   : > { %v1082_v50 = vrot.slane %v1069_v47, %v2162_v1 }
 0x3a4   : > { %v1085_v51 = vadd.f32 %v1082_v50, %v1077_v49  ;;  %v1084_v52 = vadd.f32 %v1082_v50, %v1076_v48 }
 0x3a6   : > { %v1087_v53 = vmax.f32 %v1085_v51, 0.0  ;;  %v1086_v54 = vmax.f32 %v1084_v52, 0.0 }
 0x3a8   : > { %v1088_v55 = vpack.c.bf16 %v1087_v53, %v1086_v54 }
 0x3aa   : > { %1486 = vmatmul.mubr.bf16.vlgmr.msra.gmra.mxu0 %v1088_v55 }
 0x46a   : > { %v1194_v57 = vpop.f32.mrf.mxu0 }
 0x46b   : > { %v1195_v58 = vadd.f32 %v1359_v56, %v1194_v57 }
 0x46c   : > { %v1487_v59 = vpop.f32.mrf.mxu0 }
 0x46d   : > { %1201 = vst [vmem:[#allocation12] sm:$0xff] %v1195_v58 }
 0x46e   : > { %v1197_v60 = vpop.f32.mrf.mxu0 }
 0x46f   : > { %v1198_v61 = vadd.f32 %v1359_v56, %v1197_v60 }
 0x470   : > { %v1488_v62 = vpop.f32.mrf.mxu0 }
 0x471   : > { %1202 = vst [vmem:[#allocation12 + $0x8] sm:$0xff] %v1198_v61 }
 0x472 PF: > { %p1533_p2 = scmp.eq.s32.totalorder %s1952_s22, 1  ;;  %s1850_s29 = smov [#allocation12]  }
 0x473   : > { %s1209_s26 = sshll.u32 %s1850_s29, 4  ;;  %s1210_s26 = int_to_ptr.vmem [resolvable:$true] %s1209_s26 }
 0x474   : > { %s1759_s21 = scalar_lea.vmem %s1210_s26, 256  ;;  %p1766_p8 = scmp.lt.s32.totalorder %s1210_s26, %s1210_s26 }
 0x475   : > { %p1760_p1 = scmp.ne.s32.totalorder %s1210_s26, %s1759_s21  ;;  %p1767_p6 = scmp.lt.s32.totalorder %s1759_s21, %s1759_s21 }
 0x477   : > { %p1761_p12 = pnand %p1760_p1, %p1533_p2  ;;  %p1768_p4 = por %p1767_p6, %p1766_p8 }
 0x479   : > { %p1762_p7 = pneg %p1761_p12 }
 0x47b   : > { %p1769_p3 = pnand %p1768_p4, %p1762_p7 }
 0x47d   : > { %1772 = shalt.err (!%p1769_p3)
}
 0x47e   : > { %s1851_s14 = smov 128   ;;  %s1852_s0 = smov 8  }
 0x47f   : > { %s2289_s25 = sld [smem:[#allocation28_spill]] }
 0x485   : > { %1506 = dma.vmem_to_hbm [thread:$0]  (%p1533_p2), %s1210_s26, 256, %s2289_s25, [#allocation5], %s1851_s14, %s1851_s14, %s1852_s0  }
 0x486   : > { %1816 = dma.done.wait (%p1533_p2), [#allocation5], 256  }
 0x487   : > { %1818 = vsyncadd (%p1533_p2), [#allocation5], 4294967040 }
 0x488 PF: > { %s2290_s21 = sld [smem:[#allocation19_spill]]  ;;  %s2293_s18 = smov %s1825_s19 }
 0x489   : > { %s2291_s15 = sld [smem:[#allocation18_spill]] }
 0x48a   : > { %s2292_s20 = sld [smem:[#allocation20_spill]] }
 0x48e   : > { %p30_p10 = scmp.ge.s32.totalorder %s2290_s21, 4  }
 0x48f   : > { %s2294_s19 = smov %s2291_s15 }
 0x490   :  { %32 = sbr.rel (!%p30_p10) target bundleno = 16 (0x10), region = 150 }
 0x495   :  { %1225 = vsyncpa [#allocation4], 1 }
 0x496   :  { %1227 = vsyncpa [#allocation4 + $0x1], 1 }
 0x497   :  { %1228 = vsyncpa [#allocation7], 1 }
 0x498   :  { %1230 = vsyncpa [#allocation7 + $0x1], 1 }
 0x499   :  { %1231 = vsyncpa [#allocation10], 1 }
 0x49a   :  { %1232 = vsyncpa [#allocation5], 1 }
 0x49b   :  { %1234 = vsyncpa [#allocation5 + $0x1], 1 }

</bundles_post_ra>
